<compile_context>
chip_gen: v6e
topology: v6e:2x2x1
jax: 0.10.0
libtpu: 0.0.40
codegen_flags: <defaults>
</compile_context>

<pallas_src>
import jax
import jax.numpy as jnp
from jax.experimental import pallas as pl
from jax.experimental.pallas import tpu as pltpu


# ----------------------------------------------------------------------------------
# Kernel
# ----------------------------------------------------------------------------------
def _make_layer_kernel(*, activation, valid_rows, valid_cols, tm, tk):
    """One SAGEConv layer: k-reduction over src-node tiles + fused finalize."""

    def kernel(a_ref, x_ref, inv_ref, wl_ref, wr_ref, b_ref, o_ref, acc_ref):
        i = pl.program_id(0)
        k = pl.program_id(1)

        @pl.when(k == 0)
        def _():
            acc_ref[...] = jnp.zeros_like(acc_ref)

        # Partial (unnormalized) neighbor sum for this src tile.
        # X is VMEM-resident; slice the src strip instead of re-streaming it from HBM.
        src_off = pl.multiple_of(k * tk, tk)
        x_src = x_ref[pl.ds(src_off, tk), :]
        acc_ref[...] += jnp.dot(a_ref[...], x_src,
                                preferred_element_type=jnp.float32)

        @pl.when(k == pl.num_programs(1) - 1)
        def _():
            # Exact f32 mean normalization (deferred 1/deg), then two K=128 MXU pushes
            # (lin_l on the aggregate, lin_r on the self features) -- no concat copy.
            agg = (acc_ref[...] * inv_ref[...]).astype(jnp.bfloat16)
            dst_off = pl.multiple_of(i * tm, tm)
            x_self = x_ref[pl.ds(dst_off, tm), :]
            y = (jnp.dot(agg, wl_ref[...], preferred_element_type=jnp.float32)
                 + jnp.dot(x_self, wr_ref[...], preferred_element_type=jnp.float32)
                 + b_ref[...])

            if activation == "relu":
                # Zero padded dst rows so they cannot leak into later layers.
                row = i * tm + jax.lax.broadcasted_iota(jnp.int32, y.shape, 0)
                o_ref[...] = jnp.where(row < valid_rows,
                                       jnp.maximum(y, 0.0), 0.0).astype(o_ref.dtype)
            else:  # masked log_softmax over the valid (unpadded) class columns
                col = jax.lax.broadcasted_iota(jnp.int32, y.shape, 1)
                y = jnp.where(col < valid_cols, y, -1e30)
                m = jnp.max(y, axis=1, keepdims=True)
                z = y - m
                lse = jnp.log(jnp.sum(jnp.exp(z), axis=1, keepdims=True))
                o_ref[...] = (z - lse).astype(o_ref.dtype)

    return kernel


def _sage_layer(a, x, inv_deg, w_l, w_r, b, *, tm, tk, out_dtype, activation,
                valid_rows, valid_cols):
    n_pad, fin_pad = x.shape
    fout_pad = w_l.shape[1]
    grid = (n_pad // tm, n_pad // tk)

    return pl.pallas_call(
        _make_layer_kernel(activation=activation, valid_rows=valid_rows,
                           valid_cols=valid_cols, tm=tm, tk=tk),
        out_shape=jax.ShapeDtypeStruct((n_pad, fout_pad), out_dtype),
        grid_spec=pltpu.PrefetchScalarGridSpec(
            num_scalar_prefetch=0,
            grid=grid,
            in_specs=[
                # A tile: (dst tile, src tile) -- the only per-step HBM stream.
                pl.BlockSpec((tm, tk), lambda i, k: (i, k)),
                # X: full array, constant block index -> VMEM-resident, DMA'd once.
                pl.BlockSpec((n_pad, fin_pad), lambda i, k: (0, 0)),
                # per-dst inv_deg (f32), aligned to the i axis.
                pl.BlockSpec((tm, 1), lambda i, k: (i, 0)),
                # W_l, W_r, bias: whole-array blocks.
                pl.BlockSpec((fin_pad, fout_pad), lambda i, k: (0, 0)),
                pl.BlockSpec((fin_pad, fout_pad), lambda i, k: (0, 0)),
                pl.BlockSpec((1, fout_pad), lambda i, k: (0, 0)),
            ],
            out_specs=pl.BlockSpec((tm, fout_pad), lambda i, k: (i, 0)),
            scratch_shapes=[pltpu.VMEM((tm, fin_pad), jnp.float32)],
        ),
        compiler_params=pltpu.CompilerParams(
            dimension_semantics=("parallel", "arbitrary"),
            vmem_limit_bytes=48 * 1024 * 1024,   # also fits v7x's 64 MiB per-TC VMEM
        ),
    )(a, x, inv_deg, w_l, w_r, b)


# ----------------------------------------------------------------------------------
# Wrapper (padding / adjacency glue in plain JAX)
# ----------------------------------------------------------------------------------
def _round_up(v, m):
    return ((v + m - 1) // m) * m


def _pad2(v, rows, cols):
    return jnp.pad(v, ((0, rows - v.shape[0]), (0, cols - v.shape[1])))


def graphsage_forward(x, edge_index, params, *, tm=512, tk=1024):
    """x: (N, F_in) float32 node features; edge_index: (2, E) int32 [src; dst]."""
    n, f_in = x.shape
    hidden = params["w1l"].shape[1]
    num_classes = params["w2l"].shape[1]

    # Clamp tiles for small graphs while keeping n_pad % tm == n_pad % tk == 0.
    n_min = _round_up(n, 128)
    tk = min(tk, n_min)
    tm = min(tm, tk)
    if tk % tm:
        tm = tk
    n_pad = _round_up(n, tk)

    f_in_pad = _round_up(f_in, 128)
    hid_pad = _round_up(hidden, 128)
    cls_pad = _round_up(num_classes, 128)

    src, dst = edge_index[0], edge_index[1]

    # 0/1 (edge-count) adjacency built directly in bf16 (small counts are exact);
    # no f32 N^2 pre-pass.  Mean normalization (1/deg) is applied in f32 in-kernel.
    a = jnp.zeros((n_pad, n_pad), jnp.bfloat16).at[dst, src].add(
        jnp.ones_like(src, dtype=jnp.bfloat16))
    deg = jnp.zeros((n_pad,), jnp.float32).at[dst].add(1.0)
    inv_deg = (1.0 / jnp.maximum(deg, 1.0)).reshape(n_pad, 1)

    x_p = _pad2(x.astype(jnp.float32), n_pad, f_in_pad).astype(jnp.bfloat16)

    w1l = _pad2(params["w1l"], f_in_pad, hid_pad).astype(jnp.bfloat16)
    w1r = _pad2(params["w1r"], f_in_pad, hid_pad).astype(jnp.bfloat16)
    b1 = _pad2(params["b1"], 1, hid_pad).astype(jnp.float32)
    w2l = _pad2(params["w2l"], hid_pad, cls_pad).astype(jnp.bfloat16)
    w2r = _pad2(params["w2r"], hid_pad, cls_pad).astype(jnp.bfloat16)
    b2 = _pad2(params["b2"], 1, cls_pad).astype(jnp.float32)

    # Layer 1: SAGEConv + ReLU  (bf16 output -> MXU operand of layer 2)
    h = _sage_layer(a, x_p, inv_deg, w1l, w1r, b1, tm=tm, tk=tk,
                    out_dtype=jnp.bfloat16, activation="relu",
                    valid_rows=n, valid_cols=hid_pad)
    # Layer 2: SAGEConv + masked log_softmax (f32, lane-dense 128-wide output)
    out = _sage_layer(a, h, inv_deg, w2l, w2r, b2, tm=tm, tk=tk,
                      out_dtype=jnp.float32, activation="log_softmax",
                      valid_rows=n, valid_cols=num_classes)
    return out[:n, :num_classes]


def init_params(key, f_in, hidden, num_classes):
    ks = jax.random.split(key, 6)
    s1 = 1.0 / jnp.sqrt(f_in)
    s2 = 1.0 / jnp.sqrt(hidden)
    return {
        # lin_l (bias=True) and lin_r (bias=False) of SAGEConv, stored as (in, out)
        "w1l": jax.random.normal(ks[0], (f_in, hidden), jnp.float32) * s1,
        "w1r": jax.random.normal(ks[1], (f_in, hidden), jnp.float32) * s1,
        "b1":  jax.random.normal(ks[2], (1, hidden), jnp.float32) * s1,
        "w2l": jax.random.normal(ks[3], (hidden, num_classes), jnp.float32) * s2,
        "w2r": jax.random.normal(ks[4], (hidden, num_classes), jnp.float32) * s2,
        "b2":  jax.random.normal(ks[5], (1, num_classes), jnp.float32) * s2,
    }


if __name__ == "__main__":
    # Small synthetic graph: 16 nodes, 16 input features, hidden=32, 8 classes, 40 edges.
    N, F_IN, HIDDEN, NUM_CLASSES, E = 16, 16, 32, 8, 40

    key = jax.random.PRNGKey(0)
    k_x, k_src, k_dst, k_p = jax.random.split(key, 4)

    x = jax.random.normal(k_x, (N, F_IN), jnp.float32)
    src = jax.random.randint(k_src, (E,), 0, N, dtype=jnp.int32)
    dst = jax.random.randint(k_dst, (E,), 0, N, dtype=jnp.int32)
    edge_index = jnp.stack([src, dst], axis=0)  # (2, E), PyG convention [source; target]

    params = init_params(k_p, F_IN, HIDDEN, NUM_CLASSES)

    out = graphsage_forward(x, edge_index, params)
    jax.block_until_ready(out)

    # Pure-JAX reference mirroring the kernel's precision
    # (bf16 MXU operands, exact f32 degree normalization, f32 elementwise math).
    def _q(v):
        return v.astype(jnp.bfloat16).astype(jnp.float32)

    a_cnt = jnp.zeros((N, N), jnp.float32).at[dst, src].add(1.0)
    deg = jnp.zeros((N,), jnp.float32).at[dst].add(1.0)
    inv = (1.0 / jnp.maximum(deg, 1.0)).reshape(N, 1)
    xq = _q(x)
    agg1 = (a_cnt @ xq) * inv
    y1 = _q(agg1) @ _q(params["w1l"]) + xq @ _q(params["w1r"]) + params["b1"]
    hq = _q(jnp.maximum(y1, 0.0))
    agg2 = (a_cnt @ hq) * inv
    y2 = _q(agg2) @ _q(params["w2l"]) + hq @ _q(params["w2r"]) + params["b2"]
    ref = jax.nn.log_softmax(y2, axis=1)

    assert out.shape == (N, NUM_CLASSES)
    assert bool(jnp.allclose(out, ref, atol=5e-3, rtol=5e-3)), (
        float(jnp.max(jnp.abs(out - ref))))

    print("KERNEL_OK")
</pallas_src>

<mosaic_0001>
module attributes {stable_mosaic.version = 11 : i64} {
  func.func @kernel(%arg0: i32, %arg1: i32, %arg2: memref<128x128xbf16, #tpu.memory_space<vmem>>, %arg3: memref<128x128xbf16, #tpu.memory_space<vmem>>, %arg4: memref<128x1xf32, #tpu.memory_space<vmem>>, %arg5: memref<128x128xbf16, #tpu.memory_space<vmem>>, %arg6: memref<128x128xbf16, #tpu.memory_space<vmem>>, %arg7: memref<1x128xf32, #tpu.memory_space<vmem>>, %arg8: memref<128x128xbf16, #tpu.memory_space<vmem>>, %arg9: memref<128x128xf32, #tpu.memory_space<vmem>>) attributes {dimension_semantics = [#tpu.dimension_semantics<parallel>, #tpu.dimension_semantics<arbitrary>], iteration_bounds = array<i64: 1, 1>, scalar_prefetch = 0 : i64, scratch_operands = 1 : i64, tpu.core_type = #tpu.core_type<tc>, window_params = [{transform_indices = @transform_0, window_bounds = array<i64: 128, 128>}, {pipeline_mode = #tpu.pipeline_mode<synchronous>, transform_indices = @transform_1, window_bounds = array<i64: 128, 128>}, {transform_indices = @transform_2, window_bounds = array<i64: 128, 1>}, {pipeline_mode = #tpu.pipeline_mode<synchronous>, transform_indices = @transform_3, window_bounds = array<i64: 128, 128>}, {pipeline_mode = #tpu.pipeline_mode<synchronous>, transform_indices = @transform_4, window_bounds = array<i64: 128, 128>}, {pipeline_mode = #tpu.pipeline_mode<synchronous>, transform_indices = @transform_5, window_bounds = array<i64: 1, 128>}, {transform_indices = @transform_6, window_bounds = array<i64: 128, 128>}]} {
    %c0_i32 = arith.constant 0 : i32
    %0 = arith.cmpi eq, %arg1, %c0_i32 : i32
    %1 = arith.extui %0 : i1 to i32
    %c0_i32_0 = arith.constant 0 : i32
    %2 = arith.cmpi ne, %1, %c0_i32_0 : i32
    scf.if %2 {
      %cst_9 = arith.constant 0.000000e+00 : f32
      %15 = vector.broadcast %cst_9 : f32 to vector<128x128xf32>
      %c0_10 = arith.constant 0 : index
      %c0_11 = arith.constant 0 : index
      %16 = vector.load %arg9[%c0_10, %c0_11] : memref<128x128xf32, #tpu.memory_space<vmem>>, vector<128x128xf32>
      tpu.vector_store %arg9[%c0_10, %c0_11], %15 {strides = array<i32>} : memref<128x128xf32, #tpu.memory_space<vmem>>, vector<128x128xf32>,
    } else {
    }
    %c128_i32 = arith.constant 128 : i32
    %3 = arith.muli %arg1, %c128_i32 : i32
    %4 = tpu.assume_multiple %3, 128 : i32
    %5 = arith.index_cast %4 : i32 to index
    %c0 = arith.constant 0 : index
    %6 = vector.load %arg3[%5, %c0] : memref<128x128xbf16, #tpu.memory_space<vmem>>, vector<128x128xbf16>
    %c0_1 = arith.constant 0 : index
    %c0_2 = arith.constant 0 : index
    %7 = vector.load %arg9[%c0_1, %c0_2] : memref<128x128xf32, #tpu.memory_space<vmem>>, vector<128x128xf32>
    %c0_3 = arith.constant 0 : index
    %c0_4 = arith.constant 0 : index
    %8 = vector.load %arg2[%c0_3, %c0_4] : memref<128x128xbf16, #tpu.memory_space<vmem>>, vector<128x128xbf16>
    %cst = arith.constant dense<0.000000e+00> : vector<128x128xf32>
    %9 = tpu.matmul %8, %6, %cst {dimension_numbers = #tpu.dot_dimension_numbers<[1], [0], [0], [1], [0, 0, 1, 1], [], []>} : vector<128x128xbf16>, vector<128x128xbf16>, vector<128x128xf32> -> vector<128x128xf32>
    %10 = arith.addf %7, %9 : vector<128x128xf32>
    %c0_5 = arith.constant 0 : index
    %c0_6 = arith.constant 0 : index
    %11 = vector.load %arg9[%c0_5, %c0_6] : memref<128x128xf32, #tpu.memory_space<vmem>>, vector<128x128xf32>
    tpu.vector_store %arg9[%c0_5, %c0_6], %10 {strides = array<i32>} : memref<128x128xf32, #tpu.memory_space<vmem>>, vector<128x128xf32>,
    %c0_i32_7 = arith.constant 0 : i32
    %12 = arith.cmpi eq, %arg1, %c0_i32_7 : i32
    %13 = arith.extui %12 : i1 to i32
    %c0_i32_8 = arith.constant 0 : i32
    %14 = arith.cmpi ne, %13, %c0_i32_8 : i32
    scf.if %14 {
      %c0_9 = arith.constant 0 : index
      %c0_10 = arith.constant 0 : index
      %15 = vector.load %arg9[%c0_9, %c0_10] : memref<128x128xf32, #tpu.memory_space<vmem>>, vector<128x128xf32>
      %c0_11 = arith.constant 0 : index
      %c0_12 = arith.constant 0 : index
      %16 = vector.load %arg4[%c0_11, %c0_12] : memref<128x1xf32, #tpu.memory_space<vmem>>, vector<128x1xf32>
      %17 = vector.broadcast %16 : vector<128x1xf32> to vector<128x128xf32>
      %18 = arith.mulf %15, %17 : vector<128x128xf32>
      %19 = arith.truncf %18 : vector<128x128xf32> to vector<128x128xbf16>
      %c128_i32_13 = arith.constant 128 : i32
      %20 = arith.muli %arg0, %c128_i32_13 : i32
      %21 = tpu.assume_multiple %20, 128 : i32
      %22 = arith.index_cast %21 : i32 to index
      %c0_14 = arith.constant 0 : index
      %23 = vector.load %arg3[%22, %c0_14] : memref<128x128xbf16, #tpu.memory_space<vmem>>, vector<128x128xbf16>
      %c0_15 = arith.constant 0 : index
      %c0_16 = arith.constant 0 : index
      %24 = vector.load %arg5[%c0_15, %c0_16] : memref<128x128xbf16, #tpu.memory_space<vmem>>, vector<128x128xbf16>
      %cst_17 = arith.constant dense<0.000000e+00> : vector<128x128xf32>
      %25 = tpu.matmul %19, %24, %cst_17 {dimension_numbers = #tpu.dot_dimension_numbers<[1], [0], [0], [1], [0, 0, 1, 1], [], []>} : vector<128x128xbf16>, vector<128x128xbf16>, vector<128x128xf32> -> vector<128x128xf32>
      %c0_18 = arith.constant 0 : index
      %c0_19 = arith.constant 0 : index
      %26 = vector.load %arg6[%c0_18, %c0_19] : memref<128x128xbf16, #tpu.memory_space<vmem>>, vector<128x128xbf16>
      %cst_20 = arith.constant dense<0.000000e+00> : vector<128x128xf32>
      %27 = tpu.matmul %23, %26, %cst_20 {dimension_numbers = #tpu.dot_dimension_numbers<[1], [0], [0], [1], [0, 0, 1, 1], [], []>} : vector<128x128xbf16>, vector<128x128xbf16>, vector<128x128xf32> -> vector<128x128xf32>
      %28 = arith.addf %25, %27 : vector<128x128xf32>
      %c0_21 = arith.constant 0 : index
      %c0_22 = arith.constant 0 : index
      %29 = vector.load %arg7[%c0_21, %c0_22] : memref<1x128xf32, #tpu.memory_space<vmem>>, vector<1x128xf32>
      %30 = vector.broadcast %29 : vector<1x128xf32> to vector<128x128xf32>
      %31 = arith.addf %28, %30 : vector<128x128xf32>
      %c128_i32_23 = arith.constant 128 : i32
      %32 = arith.muli %arg0, %c128_i32_23 : i32
      %33 = tpu.iota {dimensions = array<i32: 0>} : vector<128x128xi32>
      %34 = vector.broadcast %32 : i32 to vector<128x128xi32>
      %35 = arith.addi %34, %33 : vector<128x128xi32>
      %c16_i32 = arith.constant 16 : i32
      %36 = vector.broadcast %c16_i32 : i32 to vector<128x128xi32>
      %37 = arith.cmpi slt, %35, %36 : vector<128x128xi32>
      %cst_24 = arith.constant 0.000000e+00 : f32
      %38 = vector.broadcast %cst_24 : f32 to vector<128x128xf32>
      %39 = arith.maximumf %31, %38 : vector<128x128xf32>
      %cst_25 = arith.constant 0.000000e+00 : f32
      %40 = vector.broadcast %cst_25 : f32 to vector<128x128xf32>
      %41 = arith.select %37, %39, %40 : vector<128x128xi1>, vector<128x128xf32>
      %42 = arith.truncf %41 : vector<128x128xf32> to vector<128x128xbf16>
      %c0_26 = arith.constant 0 : index
      %c0_27 = arith.constant 0 : index
      %43 = vector.load %arg8[%c0_26, %c0_27] : memref<128x128xbf16, #tpu.memory_space<vmem>>, vector<128x128xbf16>
      tpu.vector_store %arg8[%c0_26, %c0_27], %42 {strides = array<i32>} : memref<128x128xbf16, #tpu.memory_space<vmem>>, vector<128x128xbf16>,
    } else {
    }
    return
  }
  func.func @transform_0(%arg0: i32, %arg1: i32) -> (i32, i32) {
    %c0_i32 = arith.constant 0 : i32
    return %arg0, %arg1 : i32, i32
  }
  func.func @transform_1(%arg0: i32, %arg1: i32) -> (i32, i32) {
    %c0_i32 = arith.constant 0 : i32
    %c0_i32_0 = arith.constant 0 : i32
    %c0_i32_1 = arith.constant 0 : i32
    return %c0_i32, %c0_i32_0 : i32, i32
  }
  func.func @transform_2(%arg0: i32, %arg1: i32) -> (i32, i32) {
    %c0_i32 = arith.constant 0 : i32
    %c0_i32_0 = arith.constant 0 : i32
    return %arg0, %c0_i32 : i32, i32
  }
  func.func @transform_3(%arg0: i32, %arg1: i32) -> (i32, i32) {
    %c0_i32 = arith.constant 0 : i32
    %c0_i32_0 = arith.constant 0 : i32
    %c0_i32_1 = arith.constant 0 : i32
    return %c0_i32, %c0_i32_0 : i32, i32
  }
  func.func @transform_4(%arg0: i32, %arg1: i32) -> (i32, i32) {
    %c0_i32 = arith.constant 0 : i32
    %c0_i32_0 = arith.constant 0 : i32
    %c0_i32_1 = arith.constant 0 : i32
    return %c0_i32, %c0_i32_0 : i32, i32
  }
  func.func @transform_5(%arg0: i32, %arg1: i32) -> (i32, i32) {
    %c0_i32 = arith.constant 0 : i32
    %c0_i32_0 = arith.constant 0 : i32
    %c0_i32_1 = arith.constant 0 : i32
    return %c0_i32, %c0_i32_0 : i32, i32
  }
  func.func @transform_6(%arg0: i32, %arg1: i32) -> (i32, i32) {
    %c0_i32 = arith.constant 0 : i32
    %c0_i32_0 = arith.constant 0 : i32
    return %arg0, %c0_i32 : i32, i32
  }
}

</mosaic_0001>

<bundles_post_ra>
// kernel: tpu_custom_call.1
= control target key start
LH: loop header
LB: loop body
LE: loop exit
PB: predicated region body
PF: predicated region fallthrough
CT: control target
= control target key end

     0   :  { %11 = vsyncpa [#allocation4], 0  ;;  %s1616_s0 = inlined_call_operand.vmem [shape: bf16[128,128], index: 0, kind: input, shape index: {}]   ;;  %s1617_s1 = inlined_call_operand.vmem [shape: bf16[128,128], index: 1, kind: input, shape index: {}]   ;;  %s1618_s2 = inlined_call_operand.vmem [shape: f32[128,1], index: 2, kind: input, shape index: {}]   ;;  %s1619_s3 = inlined_call_operand.hbm [shape: bf16[128,128], index: 3, kind: input, shape index: {}]   ;;  %s1620_s4 = inlined_call_operand.hbm [shape: bf16[128,128], index: 4, kind: input, shape index: {}]   ;;  %s1621_s5 = inlined_call_operand.vmem [shape: f32[1,128], index: 5, kind: input, shape index: {}]   ;;  %s1622_s6 = inlined_call_operand.hbm [shape: bf16[128,128], index: 6, kind: output, shape index: {}]  }
   0x1   :  { %12 = vsyncpa [#allocation7], 0 }
   0x2   :  { %13 = vsyncpa [#allocation5], 0  ;;  %s1427_s21 = smov [#allocation3]  }
   0x3   :  { %s25_s22 = sshll.u32 %s1427_s21, 4  ;;  %s26_s22 = int_to_ptr.vmem [resolvable:$true] %s25_s22 }
   0x4   :  { %s1369_s23 = scalar_lea.vmem %s26_s22, 1024  ;;  %p1374_p1 = scmp.lt.s32.totalorder %s26_s22, %s26_s22 }
   0x5   :  { %p1370_p0 = scmp.ne.s32.totalorder %s26_s22, %s1369_s23  ;;  %p1375_p2 = scmp.lt.s32.totalorder %s1369_s23, %s1369_s23 }
   0x7   :  { %p1376_p3 = por %p1375_p2, %p1374_p1 }
   0x9   :  { %p1377_p4 = pnand %p1376_p3, %p1370_p0 }
   0xb   :  { %1380 = shalt.err (!%p1377_p4)
}
   0xc   :  { %s1428_s24 = smov 64   ;;  %s1429_s25 = smov 4  }
   0xd   :  { %31 = dma.hbm_to_vmem [thread:$0]  %s1619_s3, 1024, %s26_s22, [#allocation4], %s1428_s24, %s1428_s24, %s1429_s25  }
   0xe   :  { %s1430_s28 = smov [#allocation6]  }
   0xf   :  { %s37_s29 = sshll.u32 %s1430_s28, 4  ;;  %s38_s29 = int_to_ptr.vmem [resolvable:$true] %s37_s29 }
  0x10   :  { %s1389_s30 = scalar_lea.vmem %s38_s29, 1024  ;;  %p1394_p6 = scmp.lt.s32.totalorder %s38_s29, %s38_s29 }
  0x11   :  { %p1390_p5 = scmp.ne.s32.totalorder %s38_s29, %s1389_s30  ;;  %p1395_p7 = scmp.lt.s32.totalorder %s1389_s30, %s1389_s30 }
  0x13   :  { %p1396_p8 = por %p1395_p7, %p1394_p6 }
  0x15   :  { %p1397_p9 = pnand %p1396_p8, %p1390_p5 }
  0x17   :  { %1400 = shalt.err (!%p1397_p9)
}
  0x18   :  { %43 = dma.hbm_to_vmem [thread:$0]  %s1620_s4, 1024, %s38_s29, [#allocation7], %s1428_s24, %s1428_s24, %s1429_s25  }
  0x19   :  { %1421 = dma.done.wait [#allocation4], 1024  }
  0x1a   :  { %1422 = vsyncadd [#allocation4], 4294966272 }
  0x1b   :  { %1423 = dma.done.wait [#allocation7], 1024  }
  0x1c   :  { %1424 = vsyncadd [#allocation7], 4294966272  ;;  %v1431_v0 = vmov 0   ;;  %v1321_v1 = vld [vmem:[%s1617_s1 + $0x38] sm:$0xff]   ;;  %v1322_v2 = vld [vmem:[%s1617_s1 + $0x30] sm:$0xff]   ;;  %s1433_s14 = smov [#allocation8]  }
  0x1d   :  { %1320 = vset.pattern.permute.xlu1 %v1431_v0  ;;  %1319 = vset.pattern.permute.xlu0 %v1431_v0  ;;  %v1323_v3 = vld [vmem:[%s1617_s1 + $0x28] sm:$0xff]   ;;  %v1324_v4 = vld [vmem:[%s1617_s1 + $0x20] sm:$0xff]   ;;  %v1325_v6 = vld [vmem:[%s1617_s1 + $0x18] sm:$0xff]   ;;  %s1071_s15 = sshll.u32 %s1433_s14, 4  ;;  %s1072_s15 = int_to_ptr.vmem [resolvable:$true] %s1071_s15 }
  0x1e   :  { %1200 = vmatprep.subr.bf16.mxu0 %v1321_v1  ;;  %v1329_v5 = vld [vmem:[%s1616_s0] sm:$0xff]   ;;  %v1326_v7 = vld [vmem:[%s1617_s1 + $0x10] sm:$0xff]   ;;  %v373_v10 = vld [vmem:[%s1618_s2 + $0x18] sm:$0xff]  ;;  %s1401_s16 = scalar_lea.vmem %s1072_s15, 1024  ;;  %p1406_p11 = scmp.lt.s32.totalorder %s1072_s15, %s1072_s15 }
  0x1f   :  { %1201 = vmatpush3.bf16.msra.mxu0 %v1321_v1  ;;  %1216 = vmatprep.mubr.bf16.mxu0 %v1329_v5  ;;  %v372_v8 = vld [vmem:[%s1618_s2 + $0x10] sm:$0xff]  ;;  %v370_v9 = vld [vmem:[%s1618_s2] sm:$0xff]  ;;  %v371_v11 = vld [vmem:[%s1618_s2 + $0x8] sm:$0xff]  ;;  %p1402_p10 = scmp.ne.s32.totalorder %s1072_s15, %s1401_s16  ;;  %p1407_p12 = scmp.lt.s32.totalorder %s1401_s16, %s1401_s16 }
  0x20   :  { %1202 = vmatprep.subr.bf16.mxu0 %v1322_v2  ;;  %398 = vperm.xlu1 %1320, %v372_v8   ;;  %v1327_v12 = vld [vmem:[%s1617_s1 + $0x8] sm:$0xff]   ;;  %v378_v14 = vld [vmem:[%s1618_s2 + $0x40] sm:$0xff]  ;;  %v1337_v15 = vld [vmem:[#allocation6 + $0x38] sm:$0xff]  }
  0x21   :  { %388 = vperm.xlu0 %1319, %v370_v9   ;;  %v379_v13 = vld [vmem:[%s1618_s2 + $0x48] sm:$0xff]  ;;  %v1338_v16 = vld [vmem:[#allocation6 + $0x30] sm:$0xff]   ;;  %v1328_v17 = vld [vmem:[%s1617_s1] sm:$0xff]   ;;  %1232 = vmatprep.subr.bf16.mxu1 %v1337_v15  ;;  %p1408_p13 = por %p1407_p12, %p1406_p11 }
  0x22   :  { %v381_v18 = vld [vmem:[%s1618_s2 + $0x58] sm:$0xff]  ;;  %v380_v19 = vld [vmem:[%s1618_s2 + $0x50] sm:$0xff]  ;;  %1233 = vmatpush3.bf16.msra.mxu1 %v1337_v15  ;;  %v1339_v20 = vld [vmem:[#allocation6 + $0x28] sm:$0xff]  }
  0x23   :  { %1203 = vmatpush3.bf16.msra.mxu0 %v1322_v2  ;;  %1234 = vmatprep.subr.bf16.mxu1 %v1338_v16  ;;  %v1330_v21 = vld [vmem:[%s1616_s0 + $0x8] sm:$0xff]   ;;  %v1535_v22 = vld [vmem:[#allocation3 + $0x38] sm:$0xff]   ;;  %v1331_v23 = vld [vmem:[%s1616_s0 + $0x10] sm:$0xff]   ;;  %p1409_p0 = pnand %p1408_p13, %p1402_p10 }
  0x24   :  { %1204 = vmatprep.subr.bf16.mxu0 %v1323_v3  ;;  %403 = vperm.xlu1 %1320, %v373_v10   ;;  %v375_v24 = vld [vmem:[%s1618_s2 + $0x28] sm:$0xff]  ;;  %v374_v25 = vld [vmem:[%s1618_s2 + $0x20] sm:$0xff]  ;;  %v1345_v30 = vld [vmem:[#allocation3 + $0x30] sm:$0xff]  }
  0x25   :  { %393 = vperm.xlu0 %1319, %v371_v11   ;;  %v1340_v26 = vld [vmem:[#allocation6 + $0x20] sm:$0xff]   ;;  %v383_v27 = vld [vmem:[%s1618_s2 + $0x68] sm:$0xff]  ;;  %v1341_v31 = vld [vmem:[#allocation6 + $0x18] sm:$0xff]  }
  0x26   :  { %1235 = vmatpush3.bf16.msra.mxu1 %v1338_v16  ;;  %v382_v28 = vld [vmem:[%s1618_s2 + $0x60] sm:$0xff]  ;;  %v1332_v32 = vld [vmem:[%s1616_s0 + $0x18] sm:$0xff]   ;;  %v376_v34 = vld [vmem:[%s1618_s2 + $0x30] sm:$0xff] }
  0x27   :  { %1205 = vmatpush3.bf16.msra.mxu0 %v1323_v3  ;;  %1236 = vmatprep.subr.bf16.mxu1 %v1339_v20  ;;  %v1348_v29 = vld [vmem:[%s1617_s1] sm:$0xff]   ;;  %v377_v33 = vld [vmem:[%s1618_s2 + $0x38] sm:$0xff]  ;;  %v1342_v36 = vld [vmem:[#allocation6 + $0x10] sm:$0xff]  }
  0x28   :  { %1206 = vmatprep.subr.bf16.mxu0 %v1324_v4  ;;  %433 = vperm.xlu1 %1320, %v379_v13   ;;  %v1333_v35 = vld [vmem:[%s1616_s0 + $0x20] sm:$0xff]   ;;  %v1347_v37 = vld [vmem:[#allocation3 + $0x28] sm:$0xff]   ;;  %v385_v38 = vld [vmem:[%s1618_s2 + $0x78] sm:$0xff] }
  0x29   :  { %428 = vperm.xlu0 %1319, %v378_v14   ;;  %1248 = vmatprep.mubr.bf16.mxu1 %v1348_v29  ;;  %v384_v39 = vld [vmem:[%s1618_s2 + $0x70] sm:$0xff]  ;;  %v1344_v40 = vld [vmem:[#allocation6 + $0x8] sm:$0xff]   ;;  %v1350_v41 = vld [vmem:[#allocation3 + $0x20] sm:$0xff]  }
  0x2a   :  { %1237 = vmatpush3.bf16.msra.mxu1 %v1339_v20  ;;  %v1334_v42 = vld [vmem:[%s1616_s0 + $0x28] sm:$0xff]   ;;  %v1335_v43 = vld [vmem:[%s1616_s0 + $0x30] sm:$0xff]   ;;  %v1346_v44 = vld [vmem:[#allocation6] sm:$0xff]  }
  0x2b   :  { %1207 = vmatpush3.bf16.msra.mxu0 %v1324_v4  ;;  %1238 = vmatprep.subr.bf16.mxu1 %v1340_v26  ;;  %v1351_v45 = vld [vmem:[#allocation3 + $0x18] sm:$0xff]   ;;  %v1349_v46 = vld [vmem:[%s1617_s1 + $0x8] sm:$0xff]   ;;  %v1352_v48 = vld [vmem:[%s1617_s1 + $0x10] sm:$0xff]  }
  0x2c   :  { %1208 = vmatprep.subr.bf16.mxu0 %v1325_v6  ;;  %443 = vperm.xlu1 %1320, %v381_v18   ;;  %v1336_v47 = vld [vmem:[%s1616_s0 + $0x38] sm:$0xff]   ;;  %v1354_v50 = vld [vmem:[#allocation3 + $0x10] sm:$0xff]   ;;  %v1355_v51 = vld [vmem:[#allocation3 + $0x8] sm:$0xff]  }
  0x2d   :  { %438 = vperm.xlu0 %1319, %v380_v19   ;;  %v1353_v49 = vld [vmem:[%s1617_s1 + $0x18] sm:$0xff]   ;;  %v1356_v52 = vld [vmem:[%s1617_s1 + $0x20] sm:$0xff]   ;;  %v1357_v53 = vld [vmem:[%s1617_s1 + $0x28] sm:$0xff]  }
  0x2e   :  { %1239 = vmatpush3.bf16.msra.mxu1 %v1340_v26  ;;  %v1358_v54 = vld [vmem:[#allocation3] sm:$0xff]   ;;  %v1359_v55 = vld [vmem:[%s1617_s1 + $0x30] sm:$0xff]   ;;  %v1360_v56 = vld [vmem:[%s1617_s1 + $0x38] sm:$0xff]  }
  0x2f   :  { %1209 = vmatpush3.bf16.msra.mxu0 %v1325_v6  ;;  %1240 = vmatprep.subr.bf16.mxu1 %v1341_v31 }
  0x30   :  { %1210 = vmatprep.subr.bf16.mxu0 %v1326_v7  ;;  %413 = vperm.xlu1 %1320, %v375_v24  }
  0x31   :  { %408 = vperm.xlu0 %1319, %v374_v25  }
  0x32   :  { %1241 = vmatpush3.bf16.msra.mxu1 %v1341_v31 }
  0x33   :  { %1211 = vmatpush3.bf16.msra.mxu0 %v1326_v7  ;;  %1242 = vmatprep.subr.bf16.mxu1 %v1342_v36 }
  0x34   :  { %1212 = vmatprep.subr.bf16.mxu0 %v1327_v12  ;;  %453 = vperm.xlu1 %1320, %v383_v27  }
  0x35   :  { %448 = vperm.xlu0 %1319, %v382_v28  }
  0x36   :  { %1243 = vmatpush3.bf16.msra.mxu1 %v1342_v36 }
  0x37   :  { %1213 = vmatpush3.bf16.msra.mxu0 %v1327_v12  ;;  %1244 = vmatprep.subr.bf16.mxu1 %v1344_v40 }
  0x38   :  { %1214 = vmatprep.subr.bf16.mxu0 %v1328_v17  ;;  %423 = vperm.xlu1 %1320, %v377_v33  }
  0x39   :  { %418 = vperm.xlu0 %1319, %v376_v34  }
  0x3a   :  { %1245 = vmatpush3.bf16.msra.mxu1 %v1344_v40 }
  0x3b   :  { %1215 = vmatpush3.bf16.msra.mxu0 %v1328_v17  ;;  %1246 = vmatprep.subr.bf16.mxu1 %v1346_v44 }
  0x3c   :  { %1264 = vmatprep.subr.bf16.mxu0 %v1535_v22  ;;  %463 = vperm.xlu1 %1320, %v385_v38  }
  0x3d   :  { %458 = vperm.xlu0 %1319, %v384_v39  }
  0x3e   :  { %1217 = vmatmul.mubr.bf16.vlgmr.msra.gmra.mxu0 %v1330_v21  ;;  %1247 = vmatpush3.bf16.msra.mxu1 %v1346_v44 }
  0x3f   :  { %1220 = vmatprep.mubr.bf16.mxu0 %v1331_v23  ;;  %1265 = vmatpush3.bf16.msra.mxu0 %v1535_v22 }
  0x40   :  { %1266 = vmatprep.subr.bf16.mxu0 %v1345_v30  ;;  %1296 = vmatprep.subr.bf16.mxu1 %v1535_v22 }
  0x41   :  { %1249 = vmatmul.mubr.bf16.vlgmr.msra.gmra.mxu1 %v1349_v46 }
  0x42   :  { %1304 = vmatpush3.bf16.msra.mxu1 %v1535_v22  ;;  %1252 = vmatprep.mubr.bf16.mxu1 %v1352_v48 }
  0x43   :  { %1267 = vmatpush3.bf16.msra.mxu0 %v1345_v30  ;;  %1297 = vmatprep.subr.bf16.mxu1 %v1345_v30 }
  0x44   :  { %1268 = vmatprep.subr.bf16.mxu0 %v1347_v37 }
  0x46   :  { %1221 = vmatmul.mubr.bf16.gmra.mxu0 %v1332_v32  ;;  %1305 = vmatpush3.bf16.msra.mxu1 %v1345_v30 }
  0x47   :  { %1224 = vmatprep.mubr.bf16.mxu0 %v1333_v35  ;;  %1269 = vmatpush3.bf16.msra.mxu0 %v1347_v37 }
  0x48   :  { %1270 = vmatprep.subr.bf16.mxu0 %v1350_v41  ;;  %1298 = vmatprep.subr.bf16.mxu1 %v1347_v37 }
  0x49   :  { %1253 = vmatmul.mubr.bf16.gmra.mxu1 %v1353_v49 }
  0x4a   :  { %1306 = vmatpush3.bf16.msra.mxu1 %v1347_v37  ;;  %1256 = vmatprep.mubr.bf16.mxu1 %v1356_v52 }
  0x4b   :  { %1271 = vmatpush3.bf16.msra.mxu0 %v1350_v41  ;;  %1299 = vmatprep.subr.bf16.mxu1 %v1350_v41 }
  0x4c   :  { %1272 = vmatprep.subr.bf16.mxu0 %v1351_v45 }
  0x4e   :  { %1225 = vmatmul.mubr.bf16.gmra.mxu0 %v1334_v42  ;;  %1307 = vmatpush3.bf16.msra.mxu1 %v1350_v41 }
  0x4f   :  { %1228 = vmatprep.mubr.bf16.mxu0 %v1335_v43  ;;  %1273 = vmatpush3.bf16.msra.mxu0 %v1351_v45 }
  0x50   :  { %1300 = vmatprep.subr.bf16.mxu1 %v1351_v45  ;;  %1274 = vmatprep.subr.bf16.mxu0 %v1354_v50 }
  0x51   :  { %1257 = vmatmul.mubr.bf16.gmra.mxu1 %v1357_v53 }
  0x52   :  { %1308 = vmatpush3.bf16.msra.mxu1 %v1351_v45  ;;  %1260 = vmatprep.mubr.bf16.mxu1 %v1359_v55 }
  0x53   :  { %1301 = vmatprep.subr.bf16.mxu1 %v1354_v50  ;;  %1275 = vmatpush3.bf16.msra.mxu0 %v1354_v50 }
  0x54   :  { %1276 = vmatprep.subr.bf16.mxu0 %v1355_v51 }
  0x56   :  { %1229 = vmatmul.mubr.bf16.gmra.mxu0 %v1336_v47  ;;  %1309 = vmatpush3.bf16.msra.mxu1 %v1354_v50 }
  0x57   :  { %1302 = vmatprep.subr.bf16.mxu1 %v1355_v51  ;;  %1277 = vmatpush3.bf16.msra.mxu0 %v1355_v51 }
  0x58   :  { %1278 = vmatprep.subr.bf16.mxu0 %v1358_v54 }
  0x59   :  { %1261 = vmatmul.mubr.bf16.gmra.mxu1 %v1360_v56 }
  0x5a   :  { %1310 = vmatpush3.bf16.msra.mxu1 %v1355_v51 }
  0x5b   :  { %1303 = vmatprep.subr.bf16.mxu1 %v1358_v54  ;;  %1279 = vmatpush3.bf16.msra.mxu0 %v1358_v54 }
  0x5e   :  { %1311 = vmatpush3.bf16.msra.mxu1 %v1358_v54 }
  0x9b   :  { %v399_v57 = vpop.permute.xlu1 %398 }
  0x9c   :  { %v389_v58 = vpop.permute.xlu0 %388 }
  0x9f   :  { %v404_v59 = vpop.permute.xlu1 %403 }
  0xa0   :  { %v394_v60 = vpop.permute.xlu0 %393 }
  0xa3   :  { %v434_v61 = vpop.permute.xlu1 %433 }
  0xa4   :  { %v429_v62 = vpop.permute.xlu0 %428 }
  0xa7   :  { %v444_v63 = vpop.permute.xlu1 %443 }
  0xa8   :  { %v439_v0 = vpop.permute.xlu0 %438 }
  0xab   :  { %v414_v2 = vpop.permute.xlu1 %413 }
  0xac   :  { %v409_v4 = vpop.permute.xlu0 %408 }
  0xaf   :  { %v454_v8 = vpop.permute.xlu1 %453 }
  0xb0   :  { %v449_v13 = vpop.permute.xlu0 %448 }
  0xb3   :  { %v424_v18 = vpop.permute.xlu1 %423 }
  0xb4   :  { %v419_v21 = vpop.permute.xlu0 %418 }
  0xb7   :  { %v464_v43 = vpop.permute.xlu1 %463 }
  0xb8   :  { %v459_v47 = vpop.permute.xlu0 %458 }
  0xfe   :  { %v1218_v1 = vpop.f32.mrf.mxu0 }
  0xff   :  { %v468_v11 = vmul.f32 %v1218_v1, %v399_v57  ;;  %v1432_v1 = vmov 0.0|0.0  }
 0x100   :  { %v256_v3 = vpop.f32.mrf.mxu0 }
 0x101   :  { %v466_v9 = vmul.f32 %v389_v58, %v256_v3  ;;  %v1250_v34 = vpop.f32.mrf.mxu1  ;;  %v1132_v3 = vcombine.high %v1432_v1, %v1432_v1 }
 0x102   :  { %v1219_v5 = vpop.f32.mrf.mxu0 }
 0x103   :  { %v469_v6 = vmul.f32 %v1219_v5, %v404_v59  ;;  %v673_v38 = vpop.f32.mrf.mxu1  ;;  %1053 = vst [vmem:[#allocation8 + $0xc] sm:$0xf] %v1132_v3  ;;  %1055 = vst [vmem:[#allocation8 + $0x14] sm:$0xf] %v1132_v3 }
 0x104   :  { %v259_v7 = vpop.f32.mrf.mxu0  ;;  %1057 = vst [vmem:[#allocation8 + $0x1c] sm:$0xf] %v1132_v3  ;;  %1059 = vst [vmem:[#allocation8 + $0x24] sm:$0xf] %v1132_v3 }
 0x105   :  { %v467_v10 = vmul.f32 %v394_v60, %v259_v7  ;;  %v483_v15 = vpack.c.bf16 %v469_v6, %v468_v11  ;;  %v1251_v41 = vpop.f32.mrf.mxu1  ;;  %1061 = vst [vmem:[#allocation8 + $0x2c] sm:$0xf] %v1132_v3  ;;  %1063 = vst [vmem:[#allocation8 + $0x34] sm:$0xf] %v1132_v3  ;;  %v1128_v7 = vld [vmem:[%s1621_s5] ss:$0 sm:$0xff] }
 0x106   :  { %v1222_v12 = vpop.f32.mrf.mxu0  ;;  %1065 = vst [vmem:[#allocation8 + $0x3c] sm:$0xf] %v1132_v3 }
 0x107   :  { %v482_v14 = vpack.c.bf16 %v467_v10, %v466_v9  ;;  %v472_v24 = vmul.f32 %v1222_v12, %v419_v21  ;;  %v676_v44 = vpop.f32.mrf.mxu1 }
 0x108   :  { %v272_v16 = vpop.f32.mrf.mxu0 }
 0x109   :  { %1280 = vmatprep.mubr.bf16.mxu0 %v482_v14  ;;  %v470_v22 = vmul.f32 %v409_v4, %v272_v16  ;;  %v1254_v50 = vpop.f32.mrf.mxu1 }
 0x10a   :  { %v1223_v17 = vpop.f32.mrf.mxu0  ;;  %1281 = vmatmul.mubr.bf16.vlgmr.msra.gmra.mxu0 %v483_v15 }
 0x10b   :  { %v473_v19 = vmul.f32 %v1223_v17, %v424_v18  ;;  %v689_v53 = vpop.f32.mrf.mxu1 }
 0x10c   :  { %v275_v20 = vpop.f32.mrf.mxu0 }
 0x10d   :  { %v471_v23 = vmul.f32 %v414_v2, %v275_v20  ;;  %v485_v27 = vpack.c.bf16 %v473_v19, %v472_v24  ;;  %v1255_v55 = vpop.f32.mrf.mxu1  ;;  %v1131_v2 = vcombine.low %v1432_v1, %v1432_v1 }
 0x10e   :  { %v1226_v25 = vpop.f32.mrf.mxu0 }
 0x10f   :  { %v484_v26 = vpack.c.bf16 %v471_v23, %v470_v22  ;;  %v476_v35 = vmul.f32 %v1226_v25, %v439_v0  ;;  %v692_v56 = vpop.f32.mrf.mxu1  ;;  %1052 = vst [vmem:[#allocation8 + $0x8] sm:$0xf] %v1131_v2  ;;  %1054 = vst [vmem:[#allocation8 + $0x10] sm:$0xf] %v1131_v2 }
 0x110   :  { %v288_v28 = vpop.f32.mrf.mxu0  ;;  %1056 = vst [vmem:[#allocation8 + $0x18] sm:$0xf] %v1131_v2  ;;  %1058 = vst [vmem:[#allocation8 + $0x20] sm:$0xf] %v1131_v2 }
 0x111   :  { %1284 = vmatprep.mubr.bf16.mxu0 %v484_v26  ;;  %v474_v32 = vmul.f32 %v429_v62, %v288_v28  ;;  %v1258_v57 = vpop.f32.mrf.mxu1  ;;  %1060 = vst [vmem:[#allocation8 + $0x28] sm:$0xf] %v1131_v2  ;;  %1062 = vst [vmem:[#allocation8 + $0x30] sm:$0xf] %v1131_v2 }
 0x112   :  { %v1227_v29 = vpop.f32.mrf.mxu0  ;;  %1285 = vmatmul.mubr.bf16.gmra.mxu0 %v485_v27  ;;  %1064 = vst [vmem:[#allocation8 + $0x38] sm:$0xf] %v1131_v2 }
 0x113   :  { %v477_v30 = vmul.f32 %v1227_v29, %v444_v63  ;;  %v705_v58 = vpop.f32.mrf.mxu1 }
 0x114   :  { %v291_v31 = vpop.f32.mrf.mxu0 }
 0x115   :  { %v475_v33 = vmul.f32 %v434_v61, %v291_v31  ;;  %v487_v39 = vpack.c.bf16 %v477_v30, %v476_v35  ;;  %v1259_v59 = vpop.f32.mrf.mxu1 }
 0x116   :  { %v1230_v36 = vpop.f32.mrf.mxu0 }
 0x117   :  { %v486_v37 = vpack.c.bf16 %v475_v33, %v474_v32  ;;  %v480_v51 = vmul.f32 %v1230_v36, %v459_v47  ;;  %v708_v60 = vpop.f32.mrf.mxu1 }
 0x118   :  { %v304_v40 = vpop.f32.mrf.mxu0 }
 0x119   :  { %1288 = vmatprep.mubr.bf16.mxu1 %v486_v37  ;;  %v478_v48 = vmul.f32 %v449_v13, %v304_v40  ;;  %v1262_v61 = vpop.f32.mrf.mxu1 }
 0x11a   :  { %v1231_v42 = vpop.f32.mrf.mxu0  ;;  %1289 = vmatmul.mubr.bf16.vlgmr.msra.gmra.mxu1 %v487_v39 }
 0x11b   :  { %v481_v45 = vmul.f32 %v1231_v42, %v464_v43  ;;  %v721_v62 = vpop.f32.mrf.mxu1 }
 0x11c   :  { %v307_v46 = vpop.f32.mrf.mxu0 }
 0x11d   :  { %v479_v49 = vmul.f32 %v454_v8, %v307_v46  ;;  %v489_v54 = vpack.c.bf16 %v481_v45, %v480_v51  ;;  %v1263_v63 = vpop.f32.mrf.mxu1 }
 0x11f   :  { %v488_v52 = vpack.c.bf16 %v479_v49, %v478_v48  ;;  %v724_v0 = vpop.f32.mrf.mxu1 }
 0x121   :  { %1292 = vmatprep.mubr.bf16.mxu1 %v488_v52 }
 0x122   :  { %1293 = vmatmul.mubr.bf16.gmra.mxu1 %v489_v54 }
 0x1ca   :  { %v1282_v4 = vpop.f32.mrf.mxu0 }
 0x1cc   :  { %v818_v5 = vpop.f32.mrf.mxu0 }
 0x1cd   :  { %v819_v6 = vadd.f32 %v818_v5, %v673_v38 }
 0x1ce   :  { %v1283_v8 = vpop.f32.mrf.mxu0 }
 0x1cf   :  { %v888_v10 = vadd.f32 %v1128_v7, %v819_v6 }
 0x1d0   :  { %v821_v9 = vpop.f32.mrf.mxu0 }
 0x1d1   :  { %v822_v11 = vadd.f32 %v821_v9, %v676_v44  ;;  %v954_v15 = vmax.f32 %v888_v10, 0.0 }
 0x1d2   :  { %v1286_v12 = vpop.f32.mrf.mxu0 }
 0x1d3   :  { %v889_v13 = vadd.f32 %v1128_v7, %v822_v11 }
 0x1d4   :  { %v834_v14 = vpop.f32.mrf.mxu0 }
 0x1d5   :  { %v955_v16 = vmax.f32 %v889_v13, 0.0 }
 0x1d6   :  { %v1287_v17 = vpop.f32.mrf.mxu0 }
 0x1d7   :  { %v1150_v18 = vpack.c.bf16 %v955_v16, %v954_v15 }
 0x1d8   :  { %v837_v19 = vpop.f32.mrf.mxu0 }
 0x1d9   :  { %1151 = vst [vmem:[#allocation8] sm:$0xff] %v1150_v18  }
 0x1da   :  { %v1290_v20 = vpop.f32.mrf.mxu1 }
 0x1db   :  { %1412 = shalt.err (!%p1409_p0)
}
 0x1dc   :  { %1077 = dma.vmem_to_hbm [thread:$0]  %s1072_s15, 1024, %s1622_s6, [#allocation5], %s1428_s24, %s1428_s24, %s1429_s25   ;;  %v850_v21 = vpop.f32.mrf.mxu1 }
 0x1de   :  { %v1291_v22 = vpop.f32.mrf.mxu1 }
 0x1e0   :  { %v853_v23 = vpop.f32.mrf.mxu1 }
 0x1e2   :  { %v1294_v24 = vpop.f32.mrf.mxu1 }
 0x1e4   :  { %v866_v25 = vpop.f32.mrf.mxu1 }
 0x1e6   :  { %v1295_v26 = vpop.f32.mrf.mxu1 }
 0x1e8   :  { %v869_v27 = vpop.f32.mrf.mxu1 }
 0x1e9   :  { %1425 = dma.done.wait [#allocation5], 1024  }
 0x1ea   :  { %1426 = vsyncadd [#allocation5], 4294966272 }
 0x1eb   :  { %1081 = vsyncpa [#allocation4], 1 }
 0x1ec   :  { %1082 = vsyncpa [#allocation7], 1 }
 0x1ed   :  { %1083 = vsyncpa [#allocation5], 1 }

</bundles_post_ra>
